<compile_context>
chip_gen: v7x
topology: tpu7x:2x2x1
jax: 0.10.0
libtpu: 0.0.40
codegen_flags: <defaults>
</compile_context>

<pallas_src>
import jax
import jax.numpy as jnp
import numpy as np
from jax.experimental import pallas as pl
from jax.experimental.pallas import tpu as pltpu

S = 8          # sequence length
B = 2          # batch
D_MODEL = 32   # d_model
NHEAD = 4
HEAD_DIM = D_MODEL // NHEAD
DIM_FF = 64    # dim_feedforward
EPS = 1e-5     # nn.LayerNorm default eps

# ---- packed weight-slab layout (single (224, 64) f32 array, one DMA) ----
SLAB_COLS = 2 * D_MODEL            # 64 == max(2*D, DIM_FF)
ROW_N1G, ROW_N1B, ROW_N3G, ROW_N3B = 0, 1, 2, 3
ROW_BQK, ROW_BV, ROW_BO, ROW_B1, ROW_B2 = 4, 5, 6, 7, 8
ROW_WQK = 16                       # (D, 2D)   fused [Wq*scale | Wk]
ROW_WV = 48                        # (D, D)
ROW_WO = 80                        # (D, D)
ROW_W1 = 112                       # (D, FF)
ROW_W2 = 144                       # (FF, D)
ROW_AMASK = 208                    # (S*B, S*B) additive block-diagonal mask
SLAB_ROWS = ROW_AMASK + S * B      # 224 (8-aligned section starts)


def _layernorm(x, gamma, beta):
    mean = jnp.mean(x, axis=-1, keepdims=True)
    var = jnp.mean((x - mean) ** 2, axis=-1, keepdims=True)
    return (x - mean) * jax.lax.rsqrt(var + EPS) * gamma + beta


def decoder_layer_kernel(act_ref, w_ref, o_ref):
    """act_ref: (3*S*B, D) = [rgb; dep; query_pos] flattened seq-major.
    w_ref: (224, 64) packed weight slab. o_ref: (S*B, D)."""
    f32 = jnp.float32
    sb, d = o_ref.shape
    ff = DIM_FF
    nh, hd = NHEAD, d // NHEAD

    rgb = act_ref[0:sb, :]                  # (SB, D)
    dep = act_ref[sb:2 * sb, :]
    qpos = act_ref[2 * sb:3 * sb, :]

    # static views into the packed weight slab (free)
    n1g = w_ref[ROW_N1G:ROW_N1G + 1, :d]
    n1b = w_ref[ROW_N1B:ROW_N1B + 1, :d]
    n3g = w_ref[ROW_N3G:ROW_N3G + 1, :d]
    n3b = w_ref[ROW_N3B:ROW_N3B + 1, :d]
    bqk = w_ref[ROW_BQK:ROW_BQK + 1, :2 * d]
    bv = w_ref[ROW_BV:ROW_BV + 1, :d]
    bo = w_ref[ROW_BO:ROW_BO + 1, :d]
    b1 = w_ref[ROW_B1:ROW_B1 + 1, :ff]
    b2 = w_ref[ROW_B2:ROW_B2 + 1, :d]
    wqk = w_ref[ROW_WQK:ROW_WQK + d, :2 * d]
    wv = w_ref[ROW_WV:ROW_WV + d, :d]
    wo = w_ref[ROW_WO:ROW_WO + d, :d]
    w1 = w_ref[ROW_W1:ROW_W1 + d, :ff]
    w2 = w_ref[ROW_W2:ROW_W2 + ff, :d]
    amask = w_ref[ROW_AMASK:ROW_AMASK + sb, :sb]   # 0 same-batch, -1e30 cross

    # ---- norm1(rgb) + positional embed ----
    qin = _layernorm(rgb, n1g, n1b) + qpos                     # (SB, D)

    # ---- fused [Q|K] projection (q == k; 1/sqrt(hd) folded into Wq/bq) ----
    qk = jnp.dot(qin, wqk, preferred_element_type=f32) + bqk   # (SB, 2D)
    v = jnp.dot(dep, wv, preferred_element_type=f32) + bv      # (SB, D)

    # ---- head-batched attention over the whole token slab ----
    qh = jnp.transpose(qk[:, :d].reshape(sb, nh, hd), (1, 0, 2))        # (H, SB, hd)
    kh = jnp.transpose(qk[:, d:2 * d].reshape(sb, nh, hd), (1, 0, 2))
    vh = jnp.transpose(v.reshape(sb, nh, hd), (1, 0, 2))
    s = jnp.einsum('hqd,hkd->hqk', qh, kh,
                   preferred_element_type=f32) + amask                  # (H, SB, SB)
    s = s - jnp.max(s, axis=-1, keepdims=True)
    p = jnp.exp(s)
    p = p / jnp.sum(p, axis=-1, keepdims=True)                          # exact divide
    ctx = jnp.einsum('hqk,hkd->hqd', p, vh,
                     preferred_element_type=f32)                        # (H, SB, hd)
    attn = jnp.transpose(ctx, (1, 0, 2)).reshape(sb, d)                 # (SB, D)

    # ---- out_proj ----
    attn = jnp.dot(attn, wo, preferred_element_type=f32) + bo

    # ---- residual + norm3 + FFN + residual ----
    # TODO(synk): dropout1/dropout/dropout3 implemented as identity (eval-mode).
    dep1 = dep + attn
    dep2 = _layernorm(dep1, n3g, n3b)
    h1 = jnp.maximum(jnp.dot(dep2, w1, preferred_element_type=f32) + b1, 0.0)
    h2 = jnp.dot(h1, w2, preferred_element_type=f32) + b2
    o_ref[...] = (dep1 + h2).astype(o_ref.dtype)


def prepare_weights(params):
    """One-time, host-side (numpy) weight prep + packing into a single slab.
    Hoisted out of the per-call jit: no per-forward split/transpose XLA ops."""
    scale = 1.0 / float(np.sqrt(HEAD_DIM))
    in_w = np.asarray(params['in_proj_w'], np.float32)            # (3D, D)
    in_b = np.asarray(params['in_proj_b'], np.float32).reshape(-1)  # (3D,)
    wq, wk, wv = in_w[:D_MODEL], in_w[D_MODEL:2 * D_MODEL], in_w[2 * D_MODEL:]
    bq, bk, bv = in_b[:D_MODEL], in_b[D_MODEL:2 * D_MODEL], in_b[2 * D_MODEL:]

    slab = np.zeros((SLAB_ROWS, SLAB_COLS), np.float32)

    def put(row, arr):
        arr = np.asarray(arr, np.float32)
        if arr.ndim == 1:
            arr = arr[None, :]
        slab[row:row + arr.shape[0], :arr.shape[1]] = arr

    put(ROW_N1G, np.asarray(params['norm1_g']).reshape(-1))
    put(ROW_N1B, np.asarray(params['norm1_b']).reshape(-1))
    put(ROW_N3G, np.asarray(params['norm3_g']).reshape(-1))
    put(ROW_N3B, np.asarray(params['norm3_b']).reshape(-1))
    put(ROW_BQK, np.concatenate([bq * scale, bk]))
    put(ROW_BV, bv)
    put(ROW_BO, np.asarray(params['out_proj_b']).reshape(-1))
    put(ROW_B1, np.asarray(params['lin1_b']).reshape(-1))
    put(ROW_B2, np.asarray(params['lin2_b']).reshape(-1))

    put(ROW_WQK, np.concatenate([wq.T * scale, wk.T], axis=1))    # (D, 2D)
    put(ROW_WV, wv.T)
    put(ROW_WO, np.asarray(params['out_proj_w'], np.float32).T)
    put(ROW_W1, np.asarray(params['lin1_w'], np.float32).T)       # (D, FF)
    put(ROW_W2, np.asarray(params['lin2_w'], np.float32).T)       # (FF, D)

    # additive attention mask: token row index = s*B + b; block-diagonal in batch
    idx = np.arange(S * B)
    same = (idx[:, None] % B) == (idx[None, :] % B)
    put(ROW_AMASK, np.where(same, 0.0, -1e30).astype(np.float32))
    return jnp.asarray(slab)


@jax.jit
def transformer_decoder_layer_pre(rgb, dep, query_pos, w_slab):
    """rgb, dep, query_pos: (S, B, D) seq-first (PyTorch nn.MultiheadAttention layout).
    w_slab: packed weight slab from prepare_weights()."""
    s, b, d = rgb.shape
    sb = s * b
    # free reshapes + one tiny concat -> single activation slab (one DMA)
    acts = jnp.concatenate([rgb.reshape(sb, d),
                            dep.reshape(sb, d),
                            query_pos.reshape(sb, d)], axis=0)
    vmem = pltpu.MemorySpace.VMEM
    out2d = pl.pallas_call(
        decoder_layer_kernel,
        out_shape=jax.ShapeDtypeStruct((sb, d), rgb.dtype),
        in_specs=[pl.BlockSpec(memory_space=vmem),
                  pl.BlockSpec(memory_space=vmem)],
        out_specs=pl.BlockSpec(memory_space=vmem),
    )(acts, w_slab)
    return out2d.reshape(s, b, d)


def reference_pre(rgb, dep, qpos, p):
    """Pure-JAX reference of the same forward_pre path (sanity check)."""
    hp = jax.lax.Precision.HIGHEST

    def ln(x, g, b):
        m = x.mean(-1, keepdims=True)
        v = ((x - m) ** 2).mean(-1, keepdims=True)
        return (x - m) / jnp.sqrt(v + EPS) * g + b

    rgbn = ln(rgb, p['norm1_g'][0], p['norm1_b'][0])
    q = rgbn + qpos
    k = q
    v = dep
    wq, wk, wv = jnp.split(p['in_proj_w'], 3, axis=0)
    bq, bk, bv = jnp.split(p['in_proj_b'][0], 3)
    Q = jnp.einsum('sbd,ed->sbe', q, wq, precision=hp) + bq
    K = jnp.einsum('sbd,ed->sbe', k, wk, precision=hp) + bk
    V = jnp.einsum('sbd,ed->sbe', v, wv, precision=hp) + bv
    s_, b_, d_ = Q.shape
    Qh = Q.reshape(s_, b_, NHEAD, HEAD_DIM)
    Kh = K.reshape(s_, b_, NHEAD, HEAD_DIM)
    Vh = V.reshape(s_, b_, NHEAD, HEAD_DIM)
    scores = jnp.einsum('sbhd,tbhd->bhst', Qh, Kh, precision=hp) / jnp.sqrt(
        jnp.float32(HEAD_DIM))
    probs = jax.nn.softmax(scores, axis=-1)
    attn = jnp.einsum('bhst,tbhd->sbhd', probs, Vh, precision=hp).reshape(s_, b_, d_)
    attn = jnp.einsum('sbd,ed->sbe', attn, p['out_proj_w'], precision=hp) + p['out_proj_b'][0]
    dep1 = dep + attn
    dep2 = ln(dep1, p['norm3_g'][0], p['norm3_b'][0])
    h1 = jnp.maximum(jnp.einsum('sbd,fd->sbf', dep2, p['lin1_w'], precision=hp)
                     + p['lin1_b'][0], 0.0)
    h2 = jnp.einsum('sbf,df->sbd', h1, p['lin2_w'], precision=hp) + p['lin2_b'][0]
    return dep1 + h2


if __name__ == "__main__":
    key = jax.random.PRNGKey(0)
    ks = jax.random.split(key, 16)

    # Inputs (S, B, D) seq-first, matching nn.MultiheadAttention default layout.
    rgb = jax.random.normal(ks[0], (S, B, D_MODEL), jnp.float32)
    dep = jax.random.normal(ks[1], (S, B, D_MODEL), jnp.float32)
    query_pos = 0.1 * jax.random.normal(ks[2], (S, B, D_MODEL), jnp.float32)

    params = {
        'norm1_g': 1.0 + 0.1 * jax.random.normal(ks[4], (1, D_MODEL), jnp.float32),
        'norm1_b': 0.1 * jax.random.normal(ks[5], (1, D_MODEL), jnp.float32),
        'in_proj_w': 0.1 * jax.random.normal(ks[6], (3 * D_MODEL, D_MODEL), jnp.float32),
        'in_proj_b': 0.1 * jax.random.normal(ks[7], (1, 3 * D_MODEL), jnp.float32),
        'out_proj_w': 0.1 * jax.random.normal(ks[8], (D_MODEL, D_MODEL), jnp.float32),
        'out_proj_b': 0.1 * jax.random.normal(ks[9], (1, D_MODEL), jnp.float32),
        'norm3_g': 1.0 + 0.1 * jax.random.normal(ks[10], (1, D_MODEL), jnp.float32),
        'norm3_b': 0.1 * jax.random.normal(ks[11], (1, D_MODEL), jnp.float32),
        'lin1_w': 0.1 * jax.random.normal(ks[12], (DIM_FF, D_MODEL), jnp.float32),
        'lin1_b': 0.1 * jax.random.normal(ks[13], (1, DIM_FF), jnp.float32),
        'lin2_w': 0.1 * jax.random.normal(ks[14], (D_MODEL, DIM_FF), jnp.float32),
        'lin2_b': 0.1 * jax.random.normal(ks[15], (1, D_MODEL), jnp.float32),
    }

    # one-time, host-side weight prep (hoisted out of the per-call jit)
    w_slab = jax.block_until_ready(prepare_weights(params))

    out = transformer_decoder_layer_pre(rgb, dep, query_pos, w_slab)
    out = jax.block_until_ready(out)

    ref = jax.block_until_ready(reference_pre(rgb, dep, query_pos, params))
    # exact softmax divide now; residual diff only from MXU f32 pass decomposition
    np.testing.assert_allclose(np.asarray(out), np.asarray(ref), rtol=5e-4, atol=5e-4)

    print("KERNEL_OK")
</pallas_src>

<mosaic_0001>
module attributes {stable_mosaic.version = 11 : i64} {
  func.func @decoder_layer_kernel(%arg0: memref<48x32xf32, #tpu.memory_space<vmem>>, %arg1: memref<224x64xf32, #tpu.memory_space<vmem>>, %arg2: memref<16x32xf32, #tpu.memory_space<vmem>>) attributes {dimension_semantics = [], scalar_prefetch = 0 : i64, scratch_operands = 0 : i64, tpu.core_type = #tpu.core_type<tc>} {
    %c0 = arith.constant 0 : index
    %c0_0 = arith.constant 0 : index
    %0 = vector.load %arg0[%c0, %c0_0] : memref<48x32xf32, #tpu.memory_space<vmem>>, vector<16x32xf32>
    %c16 = arith.constant 16 : index
    %c0_1 = arith.constant 0 : index
    %1 = vector.load %arg0[%c16, %c0_1] : memref<48x32xf32, #tpu.memory_space<vmem>>, vector<16x32xf32>
    %c32 = arith.constant 32 : index
    %c0_2 = arith.constant 0 : index
    %2 = vector.load %arg0[%c32, %c0_2] : memref<48x32xf32, #tpu.memory_space<vmem>>, vector<16x32xf32>
    %c0_3 = arith.constant 0 : index
    %c0_4 = arith.constant 0 : index
    %3 = vector.load %arg1[%c0_3, %c0_4] : memref<224x64xf32, #tpu.memory_space<vmem>>, vector<1x32xf32>
    %c1 = arith.constant 1 : index
    %c0_5 = arith.constant 0 : index
    %4 = vector.load %arg1[%c1, %c0_5] : memref<224x64xf32, #tpu.memory_space<vmem>>, vector<1x32xf32>
    %c2 = arith.constant 2 : index
    %c0_6 = arith.constant 0 : index
    %5 = vector.load %arg1[%c2, %c0_6] : memref<224x64xf32, #tpu.memory_space<vmem>>, vector<1x32xf32>
    %c3 = arith.constant 3 : index
    %c0_7 = arith.constant 0 : index
    %6 = vector.load %arg1[%c3, %c0_7] : memref<224x64xf32, #tpu.memory_space<vmem>>, vector<1x32xf32>
    %c4 = arith.constant 4 : index
    %c0_8 = arith.constant 0 : index
    %7 = vector.load %arg1[%c4, %c0_8] : memref<224x64xf32, #tpu.memory_space<vmem>>, vector<1x64xf32>
    %c5 = arith.constant 5 : index
    %c0_9 = arith.constant 0 : index
    %8 = vector.load %arg1[%c5, %c0_9] : memref<224x64xf32, #tpu.memory_space<vmem>>, vector<1x32xf32>
    %c6 = arith.constant 6 : index
    %c0_10 = arith.constant 0 : index
    %9 = vector.load %arg1[%c6, %c0_10] : memref<224x64xf32, #tpu.memory_space<vmem>>, vector<1x32xf32>
    %c7 = arith.constant 7 : index
    %c0_11 = arith.constant 0 : index
    %10 = vector.load %arg1[%c7, %c0_11] : memref<224x64xf32, #tpu.memory_space<vmem>>, vector<1x64xf32>
    %c8 = arith.constant 8 : index
    %c0_12 = arith.constant 0 : index
    %11 = vector.load %arg1[%c8, %c0_12] : memref<224x64xf32, #tpu.memory_space<vmem>>, vector<1x32xf32>
    %c16_13 = arith.constant 16 : index
    %c0_14 = arith.constant 0 : index
    %12 = vector.load %arg1[%c16_13, %c0_14] : memref<224x64xf32, #tpu.memory_space<vmem>>, vector<32x64xf32>
    %c48 = arith.constant 48 : index
    %c0_15 = arith.constant 0 : index
    %13 = vector.load %arg1[%c48, %c0_15] : memref<224x64xf32, #tpu.memory_space<vmem>>, vector<32x32xf32>
    %c80 = arith.constant 80 : index
    %c0_16 = arith.constant 0 : index
    %14 = vector.load %arg1[%c80, %c0_16] : memref<224x64xf32, #tpu.memory_space<vmem>>, vector<32x32xf32>
    %c112 = arith.constant 112 : index
    %c0_17 = arith.constant 0 : index
    %15 = vector.load %arg1[%c112, %c0_17] : memref<224x64xf32, #tpu.memory_space<vmem>>, vector<32x64xf32>
    %c144 = arith.constant 144 : index
    %c0_18 = arith.constant 0 : index
    %16 = vector.load %arg1[%c144, %c0_18] : memref<224x64xf32, #tpu.memory_space<vmem>>, vector<64x32xf32>
    %c208 = arith.constant 208 : index
    %c0_19 = arith.constant 0 : index
    %17 = vector.load %arg1[%c208, %c0_19] : memref<224x64xf32, #tpu.memory_space<vmem>>, vector<16x16xf32>
    %cst = arith.constant dense<0.000000e+00> : vector<16xf32>
    %18 = vector.multi_reduction <add>, %0, %cst [1] : vector<16x32xf32> to vector<16xf32>
    %19 = vector.shape_cast %18 : vector<16xf32> to vector<16x1xf32>
    %cst_20 = arith.constant 3.200000e+01 : f32
    %20 = vector.broadcast %cst_20 : f32 to vector<16x1xf32>
    %21 = arith.divf %19, %20 : vector<16x1xf32>
    %22 = vector.broadcast %21 : vector<16x1xf32> to vector<16x32xf32>
    %23 = arith.subf %0, %22 : vector<16x32xf32>
    %24 = arith.mulf %23, %23 : vector<16x32xf32>
    %cst_21 = arith.constant dense<0.000000e+00> : vector<16xf32>
    %25 = vector.multi_reduction <add>, %24, %cst_21 [1] : vector<16x32xf32> to vector<16xf32>
    %26 = vector.shape_cast %25 : vector<16xf32> to vector<16x1xf32>
    %cst_22 = arith.constant 3.200000e+01 : f32
    %27 = vector.broadcast %cst_22 : f32 to vector<16x1xf32>
    %28 = arith.divf %26, %27 : vector<16x1xf32>
    %29 = vector.broadcast %21 : vector<16x1xf32> to vector<16x32xf32>
    %30 = arith.subf %0, %29 : vector<16x32xf32>
    %cst_23 = arith.constant 9.99999974E-6 : f32
    %31 = vector.broadcast %cst_23 : f32 to vector<16x1xf32>
    %32 = arith.addf %28, %31 : vector<16x1xf32>
    %33 = math.rsqrt %32 : vector<16x1xf32>
    %34 = vector.broadcast %33 : vector<16x1xf32> to vector<16x32xf32>
    %35 = arith.mulf %30, %34 : vector<16x32xf32>
    %36 = vector.broadcast %3 : vector<1x32xf32> to vector<16x32xf32>
    %37 = arith.mulf %35, %36 : vector<16x32xf32>
    %38 = vector.broadcast %4 : vector<1x32xf32> to vector<16x32xf32>
    %39 = arith.addf %37, %38 : vector<16x32xf32>
    %40 = arith.addf %39, %2 : vector<16x32xf32>
    %cst_24 = arith.constant dense<0.000000e+00> : vector<16x64xf32>
    %41 = tpu.matmul %40, %12, %cst_24 {dimension_numbers = #tpu.dot_dimension_numbers<[1], [0], [0], [1], [0, 0, 1, 1], [], []>} : vector<16x32xf32>, vector<32x64xf32>, vector<16x64xf32> -> vector<16x64xf32>
    %42 = vector.broadcast %7 : vector<1x64xf32> to vector<16x64xf32>
    %43 = arith.addf %41, %42 : vector<16x64xf32>
    %cst_25 = arith.constant dense<0.000000e+00> : vector<16x32xf32>
    %44 = tpu.matmul %1, %13, %cst_25 {dimension_numbers = #tpu.dot_dimension_numbers<[1], [0], [0], [1], [0, 0, 1, 1], [], []>} : vector<16x32xf32>, vector<32x32xf32>, vector<16x32xf32> -> vector<16x32xf32>
    %45 = vector.broadcast %8 : vector<1x32xf32> to vector<16x32xf32>
    %46 = arith.addf %44, %45 : vector<16x32xf32>
    %47 = vector.extract_strided_slice %43 {offsets = [0, 0], sizes = [16, 32], strides = [1, 1]} : vector<16x64xf32> to vector<16x32xf32>
    %48 = vector.shape_cast %47 : vector<16x32xf32> to vector<16x4x8xf32>
    %49 = tpu.transpose %48, [1, 0, 2] : vector<16x4x8xf32> -> vector<4x16x8xf32>
    %50 = vector.extract_strided_slice %43 {offsets = [0, 32], sizes = [16, 32], strides = [1, 1]} : vector<16x64xf32> to vector<16x32xf32>
    %51 = vector.shape_cast %50 : vector<16x32xf32> to vector<16x4x8xf32>
    %52 = tpu.transpose %51, [1, 0, 2] : vector<16x4x8xf32> -> vector<4x16x8xf32>
    %53 = vector.shape_cast %46 : vector<16x32xf32> to vector<16x4x8xf32>
    %54 = tpu.transpose %53, [1, 0, 2] : vector<16x4x8xf32> -> vector<4x16x8xf32>
    "tpu.trace_start"() <{level = 10 : i32, message = "hqd,hkd->hqk"}> : () -> ()
    %cst_26 = arith.constant dense<0.000000e+00> : vector<4x16x16xf32>
    %55 = tpu.matmul %49, %52, %cst_26 {dimension_numbers = #tpu.dot_dimension_numbers<[2], [2], [1], [1], [0, 0, 0, 1, 1, 1], [0], [0]>} : vector<4x16x8xf32>, vector<4x16x8xf32>, vector<4x16x16xf32> -> vector<4x16x16xf32>
    "tpu.trace_stop"() : () -> ()
    %56 = vector.shape_cast %17 : vector<16x16xf32> to vector<1x16x16xf32>
    %57 = vector.broadcast %56 : vector<1x16x16xf32> to vector<4x16x16xf32>
    %58 = arith.addf %55, %57 : vector<4x16x16xf32>
    %cst_27 = arith.constant dense<0xFF800000> : vector<4x16xf32>
    %59 = vector.multi_reduction <maximumf>, %58, %cst_27 [2] : vector<4x16x16xf32> to vector<4x16xf32>
    %60 = vector.shape_cast %59 : vector<4x16xf32> to vector<4x16x1xf32>
    %61 = vector.broadcast %60 : vector<4x16x1xf32> to vector<4x16x16xf32>
    %62 = arith.subf %58, %61 : vector<4x16x16xf32>
    %63 = math.exp %62 : vector<4x16x16xf32>
    %cst_28 = arith.constant dense<0.000000e+00> : vector<4x16xf32>
    %64 = vector.multi_reduction <add>, %63, %cst_28 [2] : vector<4x16x16xf32> to vector<4x16xf32>
    %65 = vector.shape_cast %64 : vector<4x16xf32> to vector<4x16x1xf32>
    %66 = vector.broadcast %65 : vector<4x16x1xf32> to vector<4x16x16xf32>
    %67 = arith.divf %63, %66 : vector<4x16x16xf32>
    "tpu.trace_start"() <{level = 10 : i32, message = "hqk,hkd->hqd"}> : () -> ()
    %cst_29 = arith.constant dense<0.000000e+00> : vector<4x16x8xf32>
    %68 = tpu.matmul %67, %54, %cst_29 {dimension_numbers = #tpu.dot_dimension_numbers<[2], [1], [1], [2], [0, 0, 0, 1, 1, 2], [0], [0]>} : vector<4x16x16xf32>, vector<4x16x8xf32>, vector<4x16x8xf32> -> vector<4x16x8xf32>
    "tpu.trace_stop"() : () -> ()
    %69 = tpu.transpose %68, [1, 0, 2] : vector<4x16x8xf32> -> vector<16x4x8xf32>
    %70 = vector.shape_cast %69 : vector<16x4x8xf32> to vector<16x32xf32>
    %cst_30 = arith.constant dense<0.000000e+00> : vector<16x32xf32>
    %71 = tpu.matmul %70, %14, %cst_30 {dimension_numbers = #tpu.dot_dimension_numbers<[1], [0], [0], [1], [0, 0, 1, 1], [], []>} : vector<16x32xf32>, vector<32x32xf32>, vector<16x32xf32> -> vector<16x32xf32>
    %72 = vector.broadcast %9 : vector<1x32xf32> to vector<16x32xf32>
    %73 = arith.addf %71, %72 : vector<16x32xf32>
    %74 = arith.addf %1, %73 : vector<16x32xf32>
    %cst_31 = arith.constant dense<0.000000e+00> : vector<16xf32>
    %75 = vector.multi_reduction <add>, %74, %cst_31 [1] : vector<16x32xf32> to vector<16xf32>
    %76 = vector.shape_cast %75 : vector<16xf32> to vector<16x1xf32>
    %cst_32 = arith.constant 3.200000e+01 : f32
    %77 = vector.broadcast %cst_32 : f32 to vector<16x1xf32>
    %78 = arith.divf %76, %77 : vector<16x1xf32>
    %79 = vector.broadcast %78 : vector<16x1xf32> to vector<16x32xf32>
    %80 = arith.subf %74, %79 : vector<16x32xf32>
    %81 = arith.mulf %80, %80 : vector<16x32xf32>
    %cst_33 = arith.constant dense<0.000000e+00> : vector<16xf32>
    %82 = vector.multi_reduction <add>, %81, %cst_33 [1] : vector<16x32xf32> to vector<16xf32>
    %83 = vector.shape_cast %82 : vector<16xf32> to vector<16x1xf32>
    %cst_34 = arith.constant 3.200000e+01 : f32
    %84 = vector.broadcast %cst_34 : f32 to vector<16x1xf32>
    %85 = arith.divf %83, %84 : vector<16x1xf32>
    %86 = vector.broadcast %78 : vector<16x1xf32> to vector<16x32xf32>
    %87 = arith.subf %74, %86 : vector<16x32xf32>
    %cst_35 = arith.constant 9.99999974E-6 : f32
    %88 = vector.broadcast %cst_35 : f32 to vector<16x1xf32>
    %89 = arith.addf %85, %88 : vector<16x1xf32>
    %90 = math.rsqrt %89 : vector<16x1xf32>
    %91 = vector.broadcast %90 : vector<16x1xf32> to vector<16x32xf32>
    %92 = arith.mulf %87, %91 : vector<16x32xf32>
    %93 = vector.broadcast %5 : vector<1x32xf32> to vector<16x32xf32>
    %94 = arith.mulf %92, %93 : vector<16x32xf32>
    %95 = vector.broadcast %6 : vector<1x32xf32> to vector<16x32xf32>
    %96 = arith.addf %94, %95 : vector<16x32xf32>
    %cst_36 = arith.constant dense<0.000000e+00> : vector<16x64xf32>
    %97 = tpu.matmul %96, %15, %cst_36 {dimension_numbers = #tpu.dot_dimension_numbers<[1], [0], [0], [1], [0, 0, 1, 1], [], []>} : vector<16x32xf32>, vector<32x64xf32>, vector<16x64xf32> -> vector<16x64xf32>
    %98 = vector.broadcast %10 : vector<1x64xf32> to vector<16x64xf32>
    %99 = arith.addf %97, %98 : vector<16x64xf32>
    %cst_37 = arith.constant 0.000000e+00 : f32
    %100 = vector.broadcast %cst_37 : f32 to vector<16x64xf32>
    %101 = arith.maximumf %99, %100 : vector<16x64xf32>
    %cst_38 = arith.constant dense<0.000000e+00> : vector<16x32xf32>
    %102 = tpu.matmul %101, %16, %cst_38 {dimension_numbers = #tpu.dot_dimension_numbers<[1], [0], [0], [1], [0, 0, 1, 1], [], []>} : vector<16x64xf32>, vector<64x32xf32>, vector<16x32xf32> -> vector<16x32xf32>
    %103 = vector.broadcast %11 : vector<1x32xf32> to vector<16x32xf32>
    %104 = arith.addf %102, %103 : vector<16x32xf32>
    %105 = arith.addf %74, %104 : vector<16x32xf32>
    %c0_39 = arith.constant 0 : index
    %c0_40 = arith.constant 0 : index
    %106 = vector.load %arg2[%c0_39, %c0_40] : memref<16x32xf32, #tpu.memory_space<vmem>>, vector<16x32xf32>
    tpu.vector_store %arg2[%c0_39, %c0_40], %105 {strides = array<i32>} : memref<16x32xf32, #tpu.memory_space<vmem>>, vector<16x32xf32>,
    return
  }
}

</mosaic_0001>

<bundles_post_ra>
// kernel: transformer_decoder_layer_pre.1
= control target key start
LH: loop header
LB: loop body
LE: loop exit
PB: predicated region body
PF: predicated region fallthrough
CT: control target
= control target key end

     0   :  { %vm53_vm0 = vcmask 261120   ;;  %s3427_s0 = inlined_call_operand.vmem [shape: f32[48,32], index: 0, kind: input, shape index: {}]   ;;  %s3428_s1 = inlined_call_operand.vmem [shape: f32[224,64], index: 1, kind: input, shape index: {}]   ;;  %s3429_s2 = inlined_call_operand.hbm [shape: f32[16,32], index: 2, kind: output, shape index: {}]  }
   0x1   :  { %v12_v0 = vld [vmem:[%s3427_s0] sm:$0xff]  ;;  %v13_v1 = vld [vmem:[%s3427_s0 + $0x8] sm:$0xff] }
   0x2   :  { %7 = vsyncpa [#allocation3], 0  ;;  %v54_v2 = vsel %vm53_vm0, %v12_v0, 0.0  ;;  %v57_v3 = vsel %vm53_vm0, %v13_v1, 0.0  ;;  %v27_v14 = vld [vmem:[%s3428_s1 + $0x10] sm:$0xff]  ;;  %v28_v15 = vld [vmem:[%s3428_s1 + $0x18] sm:$0xff]  ;;  %v290_v55 = vlaneseq }
   0x3   :  { %55 = vadd.xlane.f32.xlu0 %v54_v2  ;;  %v29_v16 = vld [vmem:[%s3428_s1 + $0x20] sm:$0xff]  ;;  %v2772_v17 = vpack.c.bf16 %v28_v15, %v27_v14  ;;  %v30_v18 = vld [vmem:[%s3428_s1 + $0x28] sm:$0xff]  ;;  %s2937_s3 = smov 120   ;;  %v31_v45 = vld [vmem:[%s3428_s1 + $0x30] sm:$0xff]  ;;  %s2938_s8 = smov 112   ;;  %vm1145_vm1 = vcmask 64512  }
   0x4   :  { %v2776_v19 = vpack.c.bf16 %v30_v18, %v29_v16  ;;  %v2528_v27 = vld [vmem:[%s3428_s1] ss:$0 sm:$0xff]  ;;  %v2529_v29 = vld [vmem:[%s3428_s1 + $0x1] ss:$0 sm:$0xff]  ;;  %v17_v37 = vld [vmem:[%s3427_s0 + $0x28] sm:$0xff]  ;;  %s2939_s9 = smov 104  }
   0x5   :  { %2773 = vmatprep.subr.bf16.mxu1 %v2772_v17  ;;  %v16_v32 = vld [vmem:[%s3427_s0 + $0x20] sm:$0xff]  ;;  %v32_v46 = vld [vmem:[%s3428_s1 + $0x38] sm:$0xff]  ;;  %v34_v49 = vld [vmem:[%s3428_s1 + $0x48] sm:$0xff]  ;;  %s2940_s16 = smov 96   ;;  %v2941_v53 = vmov 1983009808  }
   0x6   :  { %2775 = vmatpush3.bf16.msra.mxu1 %v2772_v17  ;;  %v2530_v40 = vld [vmem:[%s3428_s1 + $0x4] ss:$0 sm:$0xff]  ;;  %v2780_v47 = vpack.c.bf16 %v32_v46, %v31_v45  ;;  %v14_v51 = vld [vmem:[%s3427_s0 + $0x10] sm:$0xff]  ;;  %v15_v52 = vld [vmem:[%s3427_s0 + $0x18] sm:$0xff]  ;;  %v288_v54 = vunpack.c.l.s4 %v2941_v53  ;;  %v2942_v58 = vmov 1934713408  }
   0x7   :  { %58 = vadd.xlane.f32.xlu0 %v57_v3  ;;  %2777 = vmatprep.subr.bf16.mxu1 %v2776_v19  ;;  %v33_v48 = vld [vmem:[%s3428_s1 + $0x40] sm:$0xff]  ;;  %v320_v59 = vunpack.c.l.s4 %v2942_v58  ;;  %v291_v61 = vshrl.u32 %v290_v55, 7  ;;  %vm2789_vm2 = vmpackc.low %vm1145_vm1, %vm1145_vm1  ;;  %vm1494_vm3 = vcmask 130048   ;;  %s2943_s5 = smov 8   ;;  %s2944_s6 = smov 16   ;;  %vm2207_vm4 = vcmask 195584  }
   0x8   :  { %v2784_v50 = vpack.c.bf16 %v34_v49, %v33_v48  ;;  %v289_v60 = vunpack.c.0.s8 %v288_v54  ;;  %s2945_s7 = smov 24   ;;  %vm2426_vm5 = vcmask 523264   ;;  %s2946_s17 = smov [#allocation2]  }
   0x9   :  { %s2517_s18 = sshll.u32 %s2946_s17, 4  ;;  %s2518_s18 = int_to_ptr.vmem [resolvable:$true] %s2517_s18 }
   0xa   :  { %2779 = vmatpush3.bf16.msra.mxu1 %v2776_v19  ;;  %s2913_s19 = scalar_lea.vmem %s2518_s18, 256  ;;  %p2918_p1 = scmp.lt.s32.totalorder %s2518_s18, %s2518_s18 }
   0xb   :  { %2781 = vmatprep.subr.bf16.mxu1 %v2780_v47  ;;  %p2914_p0 = scmp.ne.s32.totalorder %s2518_s18, %s2913_s19  ;;  %p2919_p2 = scmp.lt.s32.totalorder %s2913_s19, %s2913_s19 }
   0xd   :  { %p2920_p3 = por %p2919_p2, %p2918_p1 }
   0xf   :  { %p2921_p4 = pnand %p2920_p3, %p2914_p0 }
  0x90   :  { %v56_v4 = vpop.xlane.xlu0 %55 }
  0x91   :  { %v61_v5 = vmul.f32 0.03125, %v56_v4 }
  0x93   :  { %v63_v6 = vsub.f32 %v12_v0, %v61_v5  ;;  %v321_v0 = vunpack.c.0.s8 %v320_v59 }
  0x94   :  { %v59_v7 = vpop.xlane.xlu0 %58 }
  0x95   :  { %v62_v8 = vmul.f32 0.03125, %v59_v7  ;;  %v65_v9 = vmul.f32 %v63_v6, %v63_v6  ;;  %v3042_v7 = vsub.s32 %v321_v0, %v291_v61 }
  0x97   :  { %v64_v10 = vsub.f32 %v13_v1, %v62_v8  ;;  %v67_v11 = vsel %vm53_vm0, %v65_v9, 0.0  ;;  %v3039_v1 = vsub.s32 %v289_v60, %v291_v61 }
  0x98   :  { %68 = vadd.xlane.f32.xlu1 %v67_v11 }
  0x99   :  { %v66_v12 = vmul.f32 %v64_v10, %v64_v10 }
  0x9b   :  { %v70_v13 = vsel %vm53_vm0, %v66_v12, 0.0 }
  0x9c   :  { %71 = vadd.xlane.f32.xlu1 %v70_v13 }
 0x125   :  { %v69_v20 = vpop.xlane.xlu1 %68 }
 0x126   :  { %v73_v21 = vmul.f32 0.03125, %v69_v20 }
 0x128   :  { %v75_v22 = vadd.f32 1e-05, %v73_v21 }
 0x129   :  { %v72_v23 = vpop.xlane.xlu1 %71 }
 0x12a   :  { %2871 = vrsqrt.f32 %v75_v22  ;;  %v74_v24 = vmul.f32 0.03125, %v72_v23 }
 0x12c   :  { %v76_v25 = vadd.f32 1e-05, %v74_v24 }
 0x12e   :  { %2873 = vrsqrt.f32 %v76_v25 }
 0x134   :  { %v2872_v26 = vpop.eup %2871 }
 0x135   :  { %v79_v28 = vmul.f32 %v2872_v26, %v63_v6 }
 0x137   :  { %v85_v30 = vmul.f32 %v2528_v27, %v79_v28 }
 0x138   :  { %v2874_v31 = vpop.eup %2873 }
 0x139   :  { %v80_v33 = vmul.f32 %v2874_v31, %v64_v10  ;;  %v91_v34 = vadd.f32 %v2529_v29, %v85_v30 }
 0x13b   :  { %v86_v35 = vmul.f32 %v2528_v27, %v80_v33  ;;  %v93_v36 = vadd.f32 %v91_v34, %v16_v32 }
 0x13d   :  { %v92_v38 = vadd.f32 %v2529_v29, %v86_v35  ;;  %2661 = vmatprep.mubr.msk.f32.mxu1 %vm53_vm0, %v93_v36 }
 0x13f   :  { %v94_v39 = vadd.f32 %v92_v38, %v17_v37 }
 0x141   :  { %2662 = vmatmul.mubr.msk.f32.vlgmr.msra.gmra.mrb[0].mxu1 %vm53_vm0, %v94_v39 }
 0x142   :  { %2783 = vmatpush3.bf16.msra.mxu1 %v2780_v47  ;;  %2672 = vmatprep.mubr.msk.f32.mxu1 %vm53_vm0, %v14_v51 }
 0x143   :  { %2785 = vmatprep.subr.bf16.mxu1 %v2784_v50 }
 0x146   :  { %2787 = vmatpush3.bf16.msra.mxu1 %v2784_v50 }
 0x149   :  { %2673 = vmatmul.mubr.msk.f32.vlgmr.msra.gmra.mrb[2].mxu1 %vm53_vm0, %v15_v52 }
 0x214   :  { %v2663_v41 = vpop.f32.mrb[0].mxu1 }
 0x215   :  { %v3002_v42 = vadd.f32 %v2663_v41, %v2530_v40  ;;  %v171_v43 = vpop.f32.mrb[1].mxu1 }
 0x216   :  { %v172_v44 = vadd.f32 %v2530_v40, %v171_v43 }
 0x217   :  { %269 = vrot.lane.b32.xlu1 %v3002_v42, %s2937_s3 }
 0x218   :  { %267 = vrot.lane.b32.xlu0 %v172_v44, %s2937_s3 }
 0x21b   :  { %275 = vrot.lane.b32.xlu1 %v3002_v42, %s2938_s8 }
 0x21c   :  { %279 = vrot.lane.b32.xlu0 %v172_v44, %s2939_s9 }
 0x21f   :  { %273 = vrot.lane.b32.xlu1 %v172_v44, %s2938_s8 }
 0x220   :  { %557 = vrot.lane.b32.xlu0 %v172_v44, %s2940_s16 }
 0x223   :  { %281 = vrot.lane.b32.xlu1 %v3002_v42, %s2939_s9 }
 0x227   :  { %559 = vrot.lane.b32.xlu1 %v3002_v42, %s2940_s16 }
 0x289   :  { %v270_v56 = vpop.permute.xlu1 %269 }
 0x28a   :  { %563 = vrot.lane.b32.xlu1 %v270_v56, %s2940_s16  ;;  %v268_v57 = vpop.permute.xlu0 %267 }
 0x28b   :  { %561 = vrot.lane.b32.xlu0 %v268_v57, %s2940_s16 }
 0x28d   :  { %v276_v62 = vpop.permute.xlu1 %275 }
 0x28e   :  { %567 = vrot.lane.b32.xlu1 %v276_v62, %s2940_s16  ;;  %v280_v63 = vpop.permute.xlu0 %279  ;;  %v353_v12 = vcombine.low %v3002_v42, %v276_v62  ;;  %v354_v13 = vcombine.high %v3002_v42, %v276_v62 }
 0x28f   :  { %v301_v2 = vcombine.low %v268_v57, %v280_v63  ;;  %v302_v3 = vcombine.high %v268_v57, %v280_v63 }
 0x290   :  { %v361_v25 = vrot.slane %v353_v12, %v3039_v1  ;;  %v368_v26 = vrot.slane %v354_v13, %v3039_v1 }
 0x291   :  { %v274_v4 = vpop.permute.xlu1 %273  ;;  %v309_v8 = vrot.slane %v301_v2, %v3039_v1  ;;  %v316_v9 = vrot.slane %v302_v3, %v3039_v1 }
 0x292   :  { %v285_v5 = vcombine.low %v172_v44, %v274_v4  ;;  %v286_v6 = vcombine.high %v172_v44, %v274_v4  ;;  %565 = vrot.lane.b32.xlu0 %v274_v4, %s2940_s16 }
 0x294   :  { %v293_v10 = vrot.slane %v285_v5, %v3039_v1  ;;  %v300_v11 = vrot.slane %v286_v6, %v3039_v1 }
 0x295   :  { %v282_v14 = vpop.permute.xlu1 %281 }
 0x296   :  { %v317_v15 = vcombine.low %v293_v10, %v309_v8  ;;  %v318_v16 = vcombine.high %v293_v10, %v309_v8  ;;  %v333_v17 = vcombine.low %v300_v11, %v316_v9  ;;  %v334_v18 = vcombine.high %v300_v11, %v316_v9  ;;  %571 = vrot.lane.b32.xlu1 %v282_v14, %s2940_s16 }
 0x297   :  { %v369_v19 = vcombine.low %v270_v56, %v282_v14  ;;  %v370_v20 = vcombine.high %v270_v56, %v282_v14  ;;  %569 = vrot.lane.b32.xlu0 %v280_v63, %s2940_s16 }
 0x298   :  { %v325_v21 = vrot.slane %v317_v15, %v3042_v7  ;;  %v332_v22 = vrot.slane %v318_v16, %v3042_v7  ;;  %v341_v23 = vrot.slane %v333_v17, %v3042_v7  ;;  %v348_v24 = vrot.slane %v334_v18, %v3042_v7  ;;  %v3106_v15 = vpop.f32.mrb[2].mxu1  ;;  %v558_v18 = vpop.permute.xlu0 %557 }
 0x299   :  { %v377_v27 = vrot.slane %v369_v19, %v3039_v1  ;;  %v384_v28 = vrot.slane %v370_v20, %v3039_v1  ;;  %v3108_v16 = vpop.f32.mrb[3].mxu1  ;;  %v560_v17 = vpop.permute.xlu1 %559 }
 0x29a   :  { %v421_v29 = vcombine.low %v325_v21, %v332_v22  ;;  %v2536_v30 = vcombine.high %v325_v21, %v332_v22  ;;  %v437_v31 = vcombine.low %v341_v23, %v348_v24  ;;  %v2537_v32 = vcombine.high %v341_v23, %v348_v24 }
 0x29b   :  { %v385_v33 = vcombine.low %v361_v25, %v377_v27  ;;  %v386_v34 = vcombine.high %v361_v25, %v377_v27  ;;  %v401_v35 = vcombine.low %v368_v26, %v384_v28  ;;  %v402_v36 = vcombine.high %v368_v26, %v384_v28 }
 0x29c   :  { %v428_v37 = vrot.slane %v421_v29, %v3039_v1  ;;  %v436_v38 = vrot.slane %v2536_v30, %v3039_v1  ;;  %v444_v39 = vrot.slane %v437_v31, %v3039_v1  ;;  %v452_v40 = vrot.slane %v2537_v32, %v3039_v1 }
 0x29d   :  { %v393_v41 = vrot.slane %v385_v33, %v3042_v7  ;;  %v400_v42 = vrot.slane %v386_v34, %v3042_v7  ;;  %v409_v43 = vrot.slane %v401_v35, %v3042_v7  ;;  %v416_v44 = vrot.slane %v402_v36, %v3042_v7 }
 0x29e   :  { %v453_v45 = vcombine.low %v428_v37, %v436_v38  ;;  %v454_v46 = vcombine.high %v428_v37, %v436_v38  ;;  %v469_v47 = vcombine.low %v444_v39, %v452_v40  ;;  %v470_v48 = vcombine.high %v444_v39, %v452_v40 }
 0x29f   :  { %v489_v49 = vcombine.low %v393_v41, %v400_v42  ;;  %v2538_v50 = vcombine.high %v393_v41, %v400_v42  ;;  %v505_v51 = vcombine.low %v409_v43, %v416_v44  ;;  %v2539_v52 = vcombine.high %v409_v43, %v416_v44 }
 0x2a0   :  { %v461_v53 = vrot.slane %v453_v45, %v3042_v7  ;;  %v477_v54 = vrot.slane %v469_v47, %v3042_v7  ;;  %v3071_v55 = vrot.slane %v454_v46, %v3042_v7  ;;  %v3074_v56 = vrot.slane %v470_v48, %v3042_v7 }
 0x2a1   :  { %v496_v57 = vrot.slane %v489_v49, %v3039_v1  ;;  %v504_v58 = vrot.slane %v2538_v50, %v3039_v1  ;;  %v512_v59 = vrot.slane %v505_v51, %v3039_v1  ;;  %v520_v60 = vrot.slane %v2539_v52, %v3039_v1 }
 0x2a2   :  { %v485_v61 = vcombine.low %v461_v53, %v477_v54  ;;  %v486_v62 = vcombine.high %v461_v53, %v477_v54  ;;  %v487_v63 = vcombine.low %v3071_v55, %v3074_v56  ;;  %v488_v0 = vcombine.high %v3071_v55, %v3074_v56  ;;  %v51_v55 = vld [vmem:[%s3428_s1 + $0xd0] sm:$0xff] }
 0x2a3   :  { %v521_v2 = vcombine.low %v496_v57, %v504_v58  ;;  %v522_v3 = vcombine.high %v496_v57, %v504_v58  ;;  %v537_v4 = vcombine.low %v512_v59, %v520_v60  ;;  %v538_v5 = vcombine.high %v512_v59, %v520_v60 }
 0x2a4   :  { %2679 = vmatprep.mubr.msk.f32.mxu0 %vm1145_vm1, %v485_v61  ;;  %2686 = vmatprep.mubr.msk.f32.mxu1 %vm1145_vm1, %v486_v62 }
 0x2a5   :  { %v3087_v6 = vrot.slane %v521_v2, %v3042_v7  ;;  %v3090_v8 = vrot.slane %v537_v4, %v3042_v7  ;;  %v3093_v9 = vrot.slane %v522_v3, %v3042_v7  ;;  %v3096_v10 = vrot.slane %v538_v5, %v3042_v7 }
 0x2a7   :  { %v553_v11 = vcombine.low %v3087_v6, %v3090_v8  ;;  %v554_v12 = vcombine.high %v3087_v6, %v3090_v8  ;;  %v555_v13 = vcombine.low %v3093_v9, %v3096_v10  ;;  %v556_v14 = vcombine.high %v3093_v9, %v3096_v10 }
 0x2fc   :  { %v564_v19 = vpop.permute.xlu1 %563 }
 0x2fd   :  { %v562_v20 = vpop.permute.xlu0 %561 }
 0x300   :  { %v568_v21 = vpop.permute.xlu1 %567 }
 0x301   :  { %v649_v23 = vcombine.low %v560_v17, %v568_v21  ;;  %v650_v24 = vcombine.high %v560_v17, %v568_v21 }
 0x303   :  { %v657_v33 = vrot.slane %v649_v23, %v3039_v1  ;;  %v664_v34 = vrot.slane %v650_v24, %v3039_v1 }
 0x304   :  { %v566_v22 = vpop.permute.xlu0 %565 }
 0x305   :  { %v581_v25 = vcombine.low %v558_v18, %v566_v22  ;;  %v582_v26 = vcombine.high %v558_v18, %v566_v22 }
 0x307   :  { %v589_v37 = vrot.slane %v581_v25, %v3039_v1  ;;  %v596_v38 = vrot.slane %v582_v26, %v3039_v1 }
 0x308   :  { %v572_v27 = vpop.permute.xlu1 %571 }
 0x309   :  { %v665_v28 = vcombine.low %v564_v19, %v572_v27  ;;  %v666_v29 = vcombine.high %v564_v19, %v572_v27  ;;  %v570_v30 = vpop.permute.xlu0 %569 }
 0x30a   :  { %v597_v31 = vcombine.low %v562_v20, %v570_v30  ;;  %v598_v32 = vcombine.high %v562_v20, %v570_v30 }
 0x30b   :  { %v673_v35 = vrot.slane %v665_v28, %v3039_v1  ;;  %v680_v36 = vrot.slane %v666_v29, %v3039_v1 }
 0x30c   :  { %v605_v39 = vrot.slane %v597_v31, %v3039_v1  ;;  %v612_v40 = vrot.slane %v598_v32, %v3039_v1 }
 0x30d   :  { %v681_v41 = vcombine.low %v657_v33, %v673_v35  ;;  %v682_v42 = vcombine.high %v657_v33, %v673_v35  ;;  %v697_v43 = vcombine.low %v664_v34, %v680_v36  ;;  %v698_v44 = vcombine.high %v664_v34, %v680_v36 }
 0x30e   :  { %v613_v45 = vcombine.low %v589_v37, %v605_v39  ;;  %v614_v46 = vcombine.high %v589_v37, %v605_v39  ;;  %v629_v47 = vcombine.low %v596_v38, %v612_v40  ;;  %v630_v48 = vcombine.high %v596_v38, %v612_v40 }
 0x30f   :  { %v689_v49 = vrot.slane %v681_v41, %v3042_v7  ;;  %v696_v50 = vrot.slane %v682_v42, %v3042_v7  ;;  %v705_v51 = vrot.slane %v697_v43, %v3042_v7  ;;  %v712_v52 = vrot.slane %v698_v44, %v3042_v7 }
 0x310   :  { %v621_v53 = vrot.slane %v613_v45, %v3042_v7  ;;  %v628_v54 = vrot.slane %v614_v46, %v3042_v7  ;;  %v637_v57 = vrot.slane %v629_v47, %v3042_v7  ;;  %v644_v58 = vrot.slane %v630_v48, %v3042_v7 }
 0x311   :  { %v785_v59 = vcombine.low %v689_v49, %v696_v50  ;;  %v2542_v60 = vcombine.high %v689_v49, %v696_v50  ;;  %v801_v61 = vcombine.low %v705_v51, %v712_v52  ;;  %v2543_v62 = vcombine.high %v705_v51, %v712_v52 }
 0x312   :  { %v717_v2 = vcombine.low %v621_v53, %v628_v54  ;;  %v2540_v3 = vcombine.high %v621_v53, %v628_v54  ;;  %v733_v4 = vcombine.low %v637_v57, %v644_v58  ;;  %v2541_v5 = vcombine.high %v637_v57, %v644_v58 }
 0x313   :  { %v792_v17 = vrot.slane %v785_v59, %v3039_v1  ;;  %v800_v18 = vrot.slane %v2542_v60, %v3039_v1  ;;  %v808_v19 = vrot.slane %v801_v61, %v3039_v1  ;;  %v816_v20 = vrot.slane %v2543_v62, %v3039_v1 }
 0x314   :  { %v724_v21 = vrot.slane %v717_v2, %v3039_v1  ;;  %v732_v22 = vrot.slane %v2540_v3, %v3039_v1  ;;  %v740_v23 = vrot.slane %v733_v4, %v3039_v1  ;;  %v748_v24 = vrot.slane %v2541_v5, %v3039_v1 }
 0x315   :  { %v817_v25 = vcombine.low %v792_v17, %v800_v18  ;;  %v818_v26 = vcombine.high %v792_v17, %v800_v18  ;;  %v833_v27 = vcombine.low %v808_v19, %v816_v20  ;;  %v834_v28 = vcombine.high %v808_v19, %v816_v20  ;;  %v2533_v19 = vld [vmem:[%s3428_s1 + $0x5] ss:$0 sm:$0xff] }
 0x316   :  { %v749_v29 = vcombine.low %v724_v21, %v732_v22  ;;  %v750_v30 = vcombine.high %v724_v21, %v732_v22  ;;  %v765_v31 = vcombine.low %v740_v23, %v748_v24  ;;  %v766_v32 = vcombine.high %v740_v23, %v748_v24 }
 0x317   :  { %v825_v33 = vrot.slane %v817_v25, %v3042_v7  ;;  %v841_v34 = vrot.slane %v833_v27, %v3042_v7  ;;  %v832_v35 = vrot.slane %v818_v26, %v3042_v7  ;;  %v848_v36 = vrot.slane %v834_v28, %v3042_v7 }
 0x318   :  { %v757_v37 = vrot.slane %v749_v29, %v3042_v7  ;;  %v773_v38 = vrot.slane %v765_v31, %v3042_v7  ;;  %v764_v39 = vrot.slane %v750_v30, %v3042_v7  ;;  %v780_v40 = vrot.slane %v766_v32, %v3042_v7 }
 0x319   :  { %v849_v41 = vcombine.low %v825_v33, %v841_v34  ;;  %v850_v42 = vcombine.high %v825_v33, %v841_v34  ;;  %v851_v43 = vcombine.low %v832_v35, %v848_v36  ;;  %v852_v44 = vcombine.high %v832_v35, %v848_v36 }
 0x31a   :  { %v781_v45 = vcombine.low %v757_v37, %v773_v38  ;;  %v782_v46 = vcombine.high %v757_v37, %v773_v38  ;;  %v783_v47 = vcombine.low %v764_v39, %v780_v40  ;;  %v784_v48 = vcombine.high %v764_v39, %v780_v40 }
 0x31b   :  { %v3186_v20 = vadd.f32 %v3106_v15, %v2533_v19  ;;  %v3191_v21 = vadd.f32 %v2533_v19, %v3108_v16 }
 0x31c   :  { %v2788_v49 = vpack.c.bf16 %v849_v41, %v781_v45  ;;  %v2794_v50 = vpack.c.bf16 %v850_v42, %v782_v46  ;;  %v2800_v51 = vpack.c.bf16 %v851_v43, %v783_v47  ;;  %v2806_v52 = vpack.c.bf16 %v852_v44, %v784_v48 }
 0x31e   :  { %2790 = vmatprep.subr.msk.bf16.mxu0 %vm2789_vm2, %v2788_v49  ;;  %2796 = vmatprep.subr.msk.bf16.mxu1 %vm2789_vm2, %v2794_v50 }
 0x31f   :  { %2793 = vmatpush3.bf16.xpose.msk.msra.mxu0 %vm2789_vm2, %v2788_v49  ;;  %2799 = vmatpush3.bf16.xpose.msk.msra.mxu1 %vm2789_vm2, %v2794_v50 }
 0x320   :  { %2802 = vmatprep.subr.msk.bf16.mxu0 %vm2789_vm2, %v2800_v51  ;;  %2808 = vmatprep.subr.msk.bf16.mxu1 %vm2789_vm2, %v2806_v52 }
 0x326   :  { %2680 = vmatmul.mubr.msk.f32.vlgmr.msra.gmra.mrb[0].mxu0 %vm1145_vm1, %v553_v11  ;;  %2687 = vmatmul.mubr.msk.f32.vlgmr.msra.gmra.mrb[4].mxu1 %vm1145_vm1, %v554_v12 }
 0x327   :  { %2805 = vmatpush3.bf16.xpose.msk.msra.mxu0 %vm2789_vm2, %v2800_v51  ;;  %2693 = vmatprep.mubr.msk.f32.mxu0 %vm1145_vm1, %v487_v63  ;;  %v52_v63 = vld [vmem:[%s3428_s1 + $0xd8] sm:$0xff] }
 0x328   :  { %2811 = vmatpush3.bf16.xpose.msk.msra.mxu1 %vm2789_vm2, %v2806_v52  ;;  %2700 = vmatprep.mubr.msk.f32.mxu1 %vm1145_vm1, %v488_v0 }
 0x32e   :  { %2694 = vmatmul.mubr.msk.f32.vlgmr.msra.gmra.mrb[2].mxu0 %vm1145_vm1, %v555_v13 }
 0x32f   :  { %2701 = vmatmul.mubr.msk.f32.vlgmr.msra.gmra.mrb[6].mxu1 %vm1145_vm1, %v556_v14 }
 0x3f9   :  { %v2681_v56 = vpop.f32.mrb[0].mxu0  ;;  %v2688_v0 = vpop.f32.mrb[4].mxu1 }
 0x3fa   :  { %v1230_v6 = vadd.f32 %v2681_v56, %v52_v63  ;;  %v1224_v8 = vpop.f32.mrb[1].mxu0  ;;  %v1311_v11 = vpop.f32.mrb[5].mxu1  ;;  %v1317_v13 = vadd.f32 %v2688_v0, %v52_v63 }
 0x3fb   :  { %v1312_v12 = vadd.f32 %v1311_v11, %v51_v55  ;;  %v1225_v14 = vadd.f32 %v1224_v8, %v51_v55 }
 0x3fc   :  { %v1498_v9 = vsel %vm1494_vm3, %v1230_v6, -inf  ;;  %v1504_v53 = vsel %vm1494_vm3, %v1317_v13, -inf }
 0x3fd   :  { %1499 = vmax.xlane.f32.xlu0 %v1498_v9  ;;  %v1501_v10 = vsel %vm1494_vm3, %v1312_v12, -inf  ;;  %v1495_v62 = vsel %vm1494_vm3, %v1225_v14, -inf }
 0x3fe   :  { %1502 = vmax.xlane.f32.xlu1 %v1501_v10 }
 0x401   :  { %1505 = vmax.xlane.f32.xlu0 %v1504_v53  ;;  %v2695_v54 = vpop.f32.mrb[2].mxu0 }
 0x402   :  { %v2702_v57 = vpop.f32.mrb[6].mxu1  ;;  %v1398_v58 = vpop.f32.mrb[3].mxu0  ;;  %v1404_v4 = vadd.f32 %v2695_v54, %v52_v63 }
 0x403   :  { %v1485_v59 = vpop.f32.mrb[7].mxu1  ;;  %v1399_v60 = vadd.f32 %v1398_v58, %v51_v55  ;;  %v1491_v2 = vadd.f32 %v2702_v57, %v52_v63 }
 0x404   :  { %v1486_v61 = vadd.f32 %v1485_v59, %v51_v55  ;;  %v1510_v18 = vsel %vm1494_vm3, %v1404_v4, -inf }
 0x405   :  { %1496 = vmax.xlane.f32.xlu0 %v1495_v62  ;;  %v1507_v5 = vsel %vm1494_vm3, %v1399_v60, -inf  ;;  %v1516_v17 = vsel %vm1494_vm3, %v1491_v2, -inf }
 0x406   :  { %v1513_v3 = vsel %vm1494_vm3, %v1486_v61, -inf }
 0x407   :  { %1514 = vmax.xlane.f32.xlu1 %v1513_v3 }
 0x409   :  { %1508 = vmax.xlane.f32.xlu0 %v1507_v5 }
 0x40b   :  { %1517 = vmax.xlane.f32.xlu1 %v1516_v17 }
 0x40d   :  { %1511 = vmax.xlane.f32.xlu0 %v1510_v18 }
 0x41c   :  { %857 = vrot.lane.b32.xlu1 %v3186_v20, %s2937_s3 }
 0x420   :  { %861 = vrot.lane.b32.xlu1 %v3191_v21, %s2938_s8 }
 0x423   :  { %855 = vrot.lane.b32.xlu0 %v3191_v21, %s2937_s3 }
 0x424   :  { %863 = vrot.lane.b32.xlu1 %v3186_v20, %s2938_s8 }
 0x427   :  { %867 = vrot.lane.b32.xlu0 %v3191_v21, %s2939_s9 }
 0x428   :  { %869 = vrot.lane.b32.xlu1 %v3186_v20, %s2939_s9 }
 0x48a   :  { %v1500_v15 = vpop.xlane.xlu0 %1499 }
 0x48b   :  { %v1520_v22 = vsub.f32 %v1230_v6, %v1500_v15  ;;  %v1503_v23 = vpop.xlane.xlu1 %1502 }
 0x48c   :  { %v1521_v24 = vsub.f32 %v1312_v12, %v1503_v23 }
 0x48d   :  { %v1529_v16 = vmul.f32 1.442695, %v1520_v22 }
 0x48e   :  { %v1506_v25 = vpop.xlane.xlu0 %1505  ;;  %v1531_v27 = vmul.f32 1.442695, %v1521_v24 }
 0x48f   :  { %2875 = vpow2.f32 %v1529_v16  ;;  %v1522_v26 = vsub.f32 %v1317_v13, %v1506_v25 }
 0x491   :  { %v1533_v28 = vmul.f32 1.442695, %v1522_v26 }
 0x492   :  { %v1497_v29 = vpop.xlane.xlu0 %1496 }
 0x493   :  { %2877 = vpow2.f32 %v1533_v28  ;;  %v1519_v30 = vsub.f32 %v1225_v14, %v1497_v29 }
 0x494   :  { %v1515_v31 = vpop.xlane.xlu1 %1514  ;;  %2879 = vpow2.f32 %v1531_v27 }
 0x495   :  { %v1527_v32 = vmul.f32 1.442695, %v1519_v30  ;;  %v1525_v33 = vsub.f32 %v1486_v61, %v1515_v31 }
 0x496   :  { %v1509_v34 = vpop.xlane.xlu0 %1508 }
 0x497   :  { %2881 = vpow2.f32 %v1527_v32  ;;  %v1539_v35 = vmul.f32 1.442695, %v1525_v33  ;;  %v1523_v36 = vsub.f32 %v1399_v60, %v1509_v34 }
 0x498   :  { %v1518_v37 = vpop.xlane.xlu1 %1517 }
 0x499   :  { %v3203_v38 = vpop.eup %2875  ;;  %2883 = vpow2.f32 %v1539_v35  ;;  %v1535_v39 = vmul.f32 1.442695, %v1523_v36  ;;  %v1526_v40 = vsub.f32 %v1491_v2, %v1518_v37 }
 0x49a   :  { %v1512_v41 = vpop.xlane.xlu0 %1511  ;;  %v1546_v42 = vsel %vm1494_vm3, %v3203_v38, 0.0 }
 0x49b   :  { %2885 = vpow2.f32 %v1535_v39  ;;  %v1524_v43 = vsub.f32 %v1404_v4, %v1512_v41  ;;  %1547 = vadd.xlane.f32.xlu0 %v1546_v42  ;;  %v1541_v47 = vmul.f32 1.442695, %v1526_v40 }
 0x49c   :  { %v858_v44 = vpop.permute.xlu1 %857 }
 0x49d   :  { %v3207_v45 = vpop.eup %2877  ;;  %v1537_v46 = vmul.f32 1.442695, %v1524_v43 }
 0x49e   :  { %v856_v48 = vpop.permute.xlu0 %855  ;;  %v1552_v49 = vsel %vm1494_vm3, %v3207_v45, 0.0  ;;  %v3211_v50 = vpop.eup %2879 }
 0x49f   :  { %2887 = vpow2.f32 %v1537_v46  ;;  %1553 = vadd.xlane.f32.xlu1 %v1552_v49  ;;  %v1549_v0 = vsel %vm1494_vm3, %v3211_v50, 0.0 }
 0x4a0   :  { %v862_v51 = vpop.permute.xlu1 %861  ;;  %2889 = vpow2.f32 %v1541_v47 }
 0x4a1   :  { %v3213_v52 = vpop.eup %2881  ;;  %v873_v63 = vcombine.low %v3191_v21, %v862_v51  ;;  %v874_v55 = vcombine.high %v3191_v21, %v862_v51 }
 0x4a2   :  { %v868_v56 = vpop.permute.xlu0 %867  ;;  %v1543_v6 = vsel %vm1494_vm3, %v3213_v52, 0.0 }
 0x4a3   :  { %v3221_v8 = vpop.eup %2883  ;;  %v889_v11 = vcombine.low %v856_v48, %v868_v56  ;;  %v890_v12 = vcombine.high %v856_v48, %v868_v56  ;;  %1550 = vadd.xlane.f32.xlu1 %v1549_v0  ;;  %1544 = vadd.xlane.f32.xlu0 %v1543_v6  ;;  %v881_v10 = vrot.slane %v873_v63, %v3039_v1 }
 0x4a4   :  { %v864_v13 = vpop.permute.xlu1 %863  ;;  %v888_v14 = vrot.slane %v874_v55, %v3039_v1  ;;  %v1561_v57 = vsel %vm1494_vm3, %v3221_v8, 0.0 }
 0x4a5   :  { %v3223_v9 = vpop.eup %2885  ;;  %v897_v53 = vrot.slane %v889_v11, %v3039_v1  ;;  %v904_v54 = vrot.slane %v890_v12, %v3039_v1  ;;  %v941_v2 = vcombine.low %v3186_v20, %v864_v13  ;;  %v942_v3 = vcombine.high %v3186_v20, %v864_v13 }
 0x4a6   :  { %v1555_v58 = vsel %vm1494_vm3, %v3223_v9, 0.0 }
 0x4a7   :  { %v905_v59 = vcombine.low %v881_v10, %v897_v53  ;;  %v906_v60 = vcombine.high %v881_v10, %v897_v53  ;;  %v921_v61 = vcombine.low %v888_v14, %v904_v54  ;;  %v922_v62 = vcombine.high %v888_v14, %v904_v54  ;;  %1562 = vadd.xlane.f32.xlu1 %v1561_v57 }
 0x4a8   :  { %v870_v4 = vpop.permute.xlu1 %869  ;;  %1556 = vadd.xlane.f32.xlu0 %v1555_v58  ;;  %v949_v27 = vrot.slane %v941_v2, %v3039_v1  ;;  %v956_v28 = vrot.slane %v942_v3, %v3039_v1 }
 0x4a9   :  { %v3235_v5 = vpop.eup %2887  ;;  %v913_v17 = vrot.slane %v905_v59, %v3042_v7  ;;  %v920_v18 = vrot.slane %v906_v60, %v3042_v7  ;;  %v929_v19 = vrot.slane %v921_v61, %v3042_v7  ;;  %v936_v21 = vrot.slane %v922_v62, %v3042_v7 }
 0x4aa   :  { %v957_v15 = vcombine.low %v858_v44, %v870_v4  ;;  %v958_v22 = vcombine.high %v858_v44, %v870_v4  ;;  %v1558_v23 = vsel %vm1494_vm3, %v3235_v5, 0.0  ;;  %v3243_v26 = vpop.eup %2889 }
 0x4ab   :  { %v1009_v16 = vcombine.low %v913_v17, %v920_v18  ;;  %v2544_v24 = vcombine.high %v913_v17, %v920_v18  ;;  %v1025_v20 = vcombine.low %v929_v19, %v936_v21  ;;  %v2545_v25 = vcombine.high %v929_v19, %v936_v21 }
 0x4ac   :  { %v965_v29 = vrot.slane %v957_v15, %v3039_v1  ;;  %v972_v30 = vrot.slane %v958_v22, %v3039_v1  ;;  %1559 = vadd.xlane.f32.xlu0 %v1558_v23  ;;  %v1564_v40 = vsel %vm1494_vm3, %v3243_v26, 0.0 }
 0x4ad   :  { %v1016_v31 = vrot.slane %v1009_v16, %v3039_v1  ;;  %v1024_v32 = vrot.slane %v2544_v24, %v3039_v1  ;;  %v1032_v33 = vrot.slane %v1025_v20, %v3039_v1  ;;  %v1040_v34 = vrot.slane %v2545_v25, %v3039_v1 }
 0x4ae   :  { %v973_v35 = vcombine.low %v949_v27, %v965_v29  ;;  %v974_v36 = vcombine.high %v949_v27, %v965_v29  ;;  %v989_v37 = vcombine.low %v956_v28, %v972_v30  ;;  %v990_v39 = vcombine.high %v956_v28, %v972_v30 }
 0x4af   :  { %v1041_v46 = vcombine.low %v1016_v31, %v1024_v32  ;;  %v1057_v47 = vcombine.low %v1032_v33, %v1040_v34  ;;  %v1042_v55 = vcombine.high %v1016_v31, %v1024_v32  ;;  %v1058_v56 = vcombine.high %v1032_v33, %v1040_v34 }
 0x4b0   :  { %v981_v41 = vrot.slane %v973_v35, %v3042_v7  ;;  %v988_v42 = vrot.slane %v974_v36, %v3042_v7  ;;  %v997_v43 = vrot.slane %v989_v37, %v3042_v7  ;;  %v1004_v44 = vrot.slane %v990_v39, %v3042_v7  ;;  %1565 = vadd.xlane.f32.xlu0 %v1564_v40 }
 0x4b1   :  { %v1049_v13 = vrot.slane %v1041_v46, %v3042_v7  ;;  %v1065_v10 = vrot.slane %v1057_v47, %v3042_v7  ;;  %v1056_v58 = vrot.slane %v1042_v55, %v3042_v7  ;;  %v1072_v59 = vrot.slane %v1058_v56, %v3042_v7 }
 0x4b2   :  { %v1077_v48 = vcombine.low %v981_v41, %v988_v42  ;;  %v2546_v49 = vcombine.high %v981_v41, %v988_v42  ;;  %v1093_v51 = vcombine.low %v997_v43, %v1004_v44  ;;  %v2547_v63 = vcombine.high %v997_v43, %v1004_v44 }
 0x4b3   :  { %v1073_v3 = vcombine.low %v1049_v13, %v1065_v10  ;;  %v1074_v4 = vcombine.high %v1049_v13, %v1065_v10  ;;  %v1075_v23 = vcombine.low %v1056_v58, %v1072_v59  ;;  %v1076_v16 = vcombine.high %v1056_v58, %v1072_v59 }
 0x4b4   :  { %v1084_v0 = vrot.slane %v1077_v48, %v3039_v1  ;;  %v1092_v6 = vrot.slane %v2546_v49, %v3039_v1  ;;  %v1100_v11 = vrot.slane %v1093_v51, %v3039_v1  ;;  %v1108_v12 = vrot.slane %v2547_v63, %v3039_v1 }
 0x4b6   :  { %v1109_v14 = vcombine.low %v1084_v0, %v1092_v6  ;;  %v1125_v53 = vcombine.low %v1100_v11, %v1108_v12  ;;  %v1110_v54 = vcombine.high %v1084_v0, %v1092_v6  ;;  %v1126_v57 = vcombine.high %v1100_v11, %v1108_v12 }
 0x4b8   :  { %v1117_v60 = vrot.slane %v1109_v14, %v3042_v7  ;;  %v1133_v61 = vrot.slane %v1125_v53, %v3042_v7  ;;  %v1124_v62 = vrot.slane %v1110_v54, %v3042_v7  ;;  %v1140_v2 = vrot.slane %v1126_v57, %v3042_v7 }
 0x4ba   :  { %v1141_v17 = vcombine.low %v1117_v60, %v1133_v61  ;;  %v1142_v18 = vcombine.high %v1117_v60, %v1133_v61  ;;  %v1143_v19 = vcombine.low %v1124_v62, %v1140_v2  ;;  %v1144_v21 = vcombine.high %v1124_v62, %v1140_v2 }
 0x4bc   :  { %v2812_v15 = vpack.c.bf16 %v1141_v17, %v1073_v3  ;;  %v2816_v22 = vpack.c.bf16 %v1142_v18, %v1074_v4  ;;  %v2820_v24 = vpack.c.bf16 %v1143_v19, %v1075_v23  ;;  %v2824_v20 = vpack.c.bf16 %v1144_v21, %v1076_v16 }
 0x4be   :  { %2813 = vmatprep.subr.bf16.mxu0 %v2812_v15  ;;  %2817 = vmatprep.subr.bf16.mxu1 %v2816_v22 }
 0x4bf   :  { %2815 = vmatpush3.bf16.msra.mxu0 %v2812_v15  ;;  %2819 = vmatpush3.bf16.msra.mxu1 %v2816_v22 }
 0x4c0   :  { %2821 = vmatprep.subr.bf16.mxu0 %v2820_v24  ;;  %2825 = vmatprep.subr.bf16.mxu1 %v2824_v20 }
 0x528   :  { %v1548_v25 = vpop.xlane.xlu0 %1547 }
 0x529   :  { %2891 = vrcp.f32 %v1548_v25 }
 0x52c   :  { %v1554_v27 = vpop.xlane.xlu1 %1553 }
 0x52d   :  { %2893 = vrcp.f32 %v1554_v27 }
 0x530   :  { %v1551_v28 = vpop.xlane.xlu1 %1550  ;;  %v1545_v29 = vpop.xlane.xlu0 %1544 }
 0x531   :  { %2895 = vrcp.f32 %v1551_v28 }
 0x532   :  { %2897 = vrcp.f32 %v1545_v29 }
 0x533   :  { %v2892_v32 = vpop.eup %2891 }
 0x534   :  { %v1563_v30 = vpop.xlane.xlu1 %1562  ;;  %v1570_v42 = vmul.f32 %v2892_v32, %v3203_v38 }
 0x535   :  { %2899 = vrcp.f32 %v1563_v30  ;;  %v1557_v31 = vpop.xlane.xlu0 %1556 }
 0x536   :  { %2901 = vrcp.f32 %v1557_v31 }
 0x537   :  { %v2894_v34 = vpop.eup %2893 }
 0x538   :  { %v1574_v39 = vmul.f32 %v2894_v34, %v3207_v45 }
 0x539   :  { %v1560_v33 = vpop.xlane.xlu0 %1559 }
 0x53a   :  { %2903 = vrcp.f32 %v1560_v33 }
 0x53b   :  { %v2896_v35 = vpop.eup %2895 }
 0x53c   :  { %v2898_v36 = vpop.eup %2897  ;;  %v1572_v37 = vmul.f32 %v2896_v35, %v3211_v50 }
 0x53d   :  { %v1566_v40 = vpop.xlane.xlu0 %1565  ;;  %v1568_v41 = vmul.f32 %v2898_v36, %v3213_v52 }
 0x53e   :  { %2905 = vrcp.f32 %v1566_v40  ;;  %2714 = vmatprep.mubr.msk.f32.mxu1 %vm1494_vm3, %v1572_v37 }
 0x53f   :  { %v2900_v43 = vpop.eup %2899  ;;  %2707 = vmatprep.mubr.msk.f32.mxu0 %vm1494_vm3, %v1568_v41  ;;  %2715 = vmatmul.mubr.msk.f32.vlgmr.msra.gmra.mrb[8].mxu1 %vm1494_vm3, %v1574_v39 }
 0x540   :  { %v2902_v44 = vpop.eup %2901  ;;  %2708 = vmatmul.mubr.msk.f32.vlgmr.msra.gmra.mrb[4].mxu0 %vm1494_vm3, %v1570_v42  ;;  %2827 = vmatpush3.bf16.msra.mxu1 %v2824_v20  ;;  %v1580_v50 = vmul.f32 %v2900_v43, %v3221_v8 }
 0x541   :  { %2823 = vmatpush3.bf16.msra.mxu0 %v2820_v24  ;;  %v1576_v45 = vmul.f32 %v2902_v44, %v3223_v9 }
 0x542   :  { %2728 = vmatprep.mubr.msk.f32.mxu1 %vm1494_vm3, %v1580_v50 }
 0x543   :  { %2721 = vmatprep.mubr.msk.f32.mxu0 %vm1494_vm3, %v1576_v45 }
 0x544   :  { %v2904_v38 = vpop.eup %2903 }
 0x545   :  { %v1578_v52 = vmul.f32 %v2904_v38, %v3235_v5 }
 0x547   :  { %2722 = vmatmul.mubr.msk.f32.vlgmr.msra.gmra.mrb[6].mxu0 %vm1494_vm3, %v1578_v52 }
 0x548   :  { %v2906_v46 = vpop.eup %2905 }
 0x549   :  { %v1582_v47 = vmul.f32 %v2906_v46, %v3243_v26 }
 0x54b   :  { %2729 = vmatmul.mubr.msk.f32.vlgmr.msra.gmra.mrb[10].mxu1 %vm1494_vm3, %v1582_v47 }
 0x612   :  { %v2716_v48 = vpop.f32.mrb[8].mxu1 }
 0x613   :  { %v2709_v49 = vpop.f32.mrb[4].mxu0  ;;  %v1736_v8 = vpop.f32.mrb[9].mxu1 }
 0x614   :  { %v1655_v51 = vpop.f32.mrb[5].mxu0 }
 0x61a   :  { %v2723_v63 = vpop.f32.mrb[6].mxu0 }
 0x61b   :  { %v1975_v9 = vcombine.low %v2709_v49, %v2723_v63  ;;  %v1976_v55 = vcombine.high %v2709_v49, %v2723_v63  ;;  %v1817_v56 = vpop.f32.mrb[7].mxu0 }
 0x61c   :  { %v1907_v0 = vcombine.low %v1655_v51, %v1817_v56  ;;  %v1908_v6 = vcombine.high %v1655_v51, %v1817_v56 }
 0x61d   :  { %v1983_v26 = vrot.slane %v1975_v9, %v3039_v1  ;;  %v1990_v53 = vrot.slane %v1976_v55, %v3039_v1 }
 0x61e   :  { %v2730_v11 = vpop.f32.mrb[10].mxu1  ;;  %v1915_v58 = vrot.slane %v1907_v0, %v3039_v1  ;;  %v1922_v59 = vrot.slane %v1908_v6, %v3039_v1 }
 0x61f   :  { %v1991_v12 = vcombine.low %v2716_v48, %v2730_v11  ;;  %v1992_v5 = vcombine.high %v2716_v48, %v2730_v11  ;;  %v1898_v13 = vpop.f32.mrb[11].mxu1  ;;  %v36_v11 = vld [vmem:[%s3428_s1 + $0x58] sm:$0xff] }
 0x620   :  { %v1923_v10 = vcombine.low %v1736_v8, %v1898_v13  ;;  %v1924_v14 = vcombine.high %v1736_v8, %v1898_v13 }
 0x621   :  { %v1999_v54 = vrot.slane %v1991_v12, %v3039_v1  ;;  %v2006_v57 = vrot.slane %v1992_v5, %v3039_v1  ;;  %v37_v12 = vld [vmem:[%s3428_s1 + $0x60] sm:$0xff]  ;;  %v38_v5 = vld [vmem:[%s3428_s1 + $0x68] sm:$0xff] }
 0x622   :  { %v1931_v60 = vrot.slane %v1923_v10, %v3039_v1  ;;  %v1938_v61 = vrot.slane %v1924_v14, %v3039_v1 }
 0x623   :  { %v2007_v62 = vcombine.low %v1983_v26, %v1999_v54  ;;  %v2008_v2 = vcombine.high %v1983_v26, %v1999_v54  ;;  %v2023_v3 = vcombine.low %v1990_v53, %v2006_v57  ;;  %v2024_v4 = vcombine.high %v1990_v53, %v2006_v57 }
 0x624   :  { %v1939_v17 = vcombine.low %v1915_v58, %v1931_v60  ;;  %v1940_v18 = vcombine.high %v1915_v58, %v1931_v60  ;;  %v1955_v19 = vcombine.low %v1922_v59, %v1938_v61  ;;  %v1956_v21 = vcombine.high %v1922_v59, %v1938_v61 }
 0x625   :  { %v2015_v15 = vrot.slane %v2007_v62, %v3042_v7  ;;  %v2022_v22 = vrot.slane %v2008_v2, %v3042_v7  ;;  %v2031_v23 = vrot.slane %v2023_v3, %v3042_v7  ;;  %v2038_v16 = vrot.slane %v2024_v4, %v3042_v7 }
 0x626   :  { %v1947_v24 = vrot.slane %v1939_v17, %v3042_v7  ;;  %v1954_v20 = vrot.slane %v1940_v18, %v3042_v7  ;;  %v1963_v25 = vrot.slane %v1955_v19, %v3042_v7  ;;  %v1970_v27 = vrot.slane %v1956_v21, %v3042_v7 }
 0x627   :  { %v2111_v28 = vcombine.low %v2015_v15, %v2022_v22  ;;  %v2574_v29 = vcombine.high %v2015_v15, %v2022_v22  ;;  %v2127_v30 = vcombine.low %v2031_v23, %v2038_v16  ;;  %v2575_v31 = vcombine.high %v2031_v23, %v2038_v16  ;;  %v2576_v23 = vld [vmem:[%s3428_s1 + $0x6] ss:$0 sm:$0xff] }
 0x628   :  { %v2043_v32 = vcombine.low %v1947_v24, %v1954_v20  ;;  %v2572_v33 = vcombine.high %v1947_v24, %v1954_v20  ;;  %v2059_v34 = vcombine.low %v1963_v25, %v1970_v27  ;;  %v2573_v35 = vcombine.high %v1963_v25, %v1970_v27  ;;  %v2911_v27 = vld [vmem:[%s3427_s0 + $0x18] sm:$0xff] }
 0x629   :  { %v2118_v36 = vrot.slane %v2111_v28, %v3039_v1  ;;  %v2126_v37 = vrot.slane %v2574_v29, %v3039_v1  ;;  %v2134_v39 = vrot.slane %v2127_v30, %v3039_v1  ;;  %v2142_v40 = vrot.slane %v2575_v31, %v3039_v1  ;;  %v2912_v29 = vld [vmem:[%s3427_s0 + $0x10] sm:$0xff] }
 0x62a   :  { %v2050_v41 = vrot.slane %v2043_v32, %v3039_v1  ;;  %v2058_v42 = vrot.slane %v2572_v33, %v3039_v1  ;;  %v2066_v43 = vrot.slane %v2059_v34, %v3039_v1  ;;  %v2074_v44 = vrot.slane %v2573_v35, %v3039_v1  ;;  %v35_v1 = vld [vmem:[%s3428_s1 + $0x50] sm:$0xff] }
 0x62b   :  { %v2143_v50 = vcombine.low %v2118_v36, %v2126_v37  ;;  %v2159_v45 = vcombine.low %v2134_v39, %v2142_v40  ;;  %v2144_v38 = vcombine.high %v2118_v36, %v2126_v37  ;;  %v2160_v52 = vcombine.high %v2134_v39, %v2142_v40 }
 0x62c   :  { %v2075_v46 = vcombine.low %v2050_v41, %v2058_v42  ;;  %v2091_v47 = vcombine.low %v2066_v43, %v2074_v44  ;;  %v2076_v48 = vcombine.high %v2050_v41, %v2058_v42  ;;  %v2092_v49 = vcombine.high %v2066_v43, %v2074_v44  ;;  %v39_v44 = vld [vmem:[%s3428_s1 + $0x70] sm:$0xff] }
 0x62d   :  { %v2151_v8 = vrot.slane %v2143_v50, %v3042_v7  ;;  %v2167_v51 = vrot.slane %v2159_v45, %v3042_v7  ;;  %v2158_v63 = vrot.slane %v2144_v38, %v3042_v7  ;;  %v2174_v9 = vrot.slane %v2160_v52, %v3042_v7  ;;  %v40_v50 = vld [vmem:[%s3428_s1 + $0x78] sm:$0xff]  ;;  %v41_v38 = vld [vmem:[%s3428_s1 + $0x80] sm:$0xff]  ;;  %v42_v52 = vld [vmem:[%s3428_s1 + $0x88] sm:$0xff] }
 0x62e   :  { %v2083_v55 = vrot.slane %v2075_v46, %v3042_v7  ;;  %v2099_v56 = vrot.slane %v2091_v47, %v3042_v7  ;;  %v2090_v0 = vrot.slane %v2076_v48, %v3042_v7  ;;  %v2106_v6 = vrot.slane %v2092_v49, %v3042_v7  ;;  %v43_v47 = vld [vmem:[%s3428_s1 + $0x90] sm:$0xff]  ;;  %v44_v48 = vld [vmem:[%s3428_s1 + $0x98] sm:$0xff]  ;;  %v45_v49 = vld [vmem:[%s3428_s1 + $0xa0] sm:$0xff] }
 0x62f   :  { %v2176_v13 = vcombine.high %v2151_v8, %v2167_v51  ;;  %v2177_v10 = vcombine.low %v2158_v63, %v2174_v9  ;;  %v2178_v14 = vcombine.high %v2158_v63, %v2174_v9  ;;  %v2175_v26 = vcombine.low %v2151_v8, %v2167_v51  ;;  %v46_v51 = vld [vmem:[%s3428_s1 + $0xa8] sm:$0xff]  ;;  %v47_v9 = vld [vmem:[%s3428_s1 + $0xb0] sm:$0xff] }
 0x630   :  { %v2108_v53 = vcombine.high %v2083_v55, %v2099_v56  ;;  %v2110_v54 = vcombine.high %v2090_v0, %v2106_v6  ;;  %v2109_v57 = vcombine.low %v2090_v0, %v2106_v6  ;;  %v2107_v7 = vcombine.low %v2083_v55, %v2099_v56 }
 0x631   :  { %2183 = vrot.lane.b32.xlu1 %v2176_v13, %s2943_s5  ;;  %v2828_v58 = vpack.c.bf16 %v36_v11, %v35_v1  ;;  %v2832_v59 = vpack.c.bf16 %v38_v5, %v37_v12  ;;  %v2836_v45 = vpack.c.bf16 %v40_v50, %v39_v44  ;;  %v2840_v46 = vpack.c.bf16 %v42_v52, %v41_v38  ;;  %v48_v1 = vld [vmem:[%s3428_s1 + $0xb8] sm:$0xff] }
 0x632   :  { %2181 = vrot.lane.b32.xlu0 %v2108_v53, %s2943_s5  ;;  %v2844_v8 = vpack.c.bf16 %v44_v48, %v43_v47  ;;  %v2848_v63 = vpack.c.bf16 %v46_v51, %v45_v49  ;;  %v2852_v55 = vpack.c.bf16 %v48_v1, %v47_v9 }
 0x633   :  { %2829 = vmatprep.subr.bf16.mxu0 %v2828_v58  ;;  %2837 = vmatprep.subr.bf16.mxu1 %v2836_v45 }
 0x634   :  { %2831 = vmatpush3.bf16.msra.mxu0 %v2828_v58  ;;  %2839 = vmatpush3.bf16.msra.mxu1 %v2836_v45 }
 0x635   :  { %2191 = vrot.lane.b32.xlu1 %v2177_v10, %s2944_s6  ;;  %2833 = vmatprep.subr.bf16.mxu0 %v2832_v59  ;;  %v2579_v10 = vld [vmem:[%s3428_s1 + $0x2] ss:$0 sm:$0xff] }
 0x636   :  { %2197 = vrot.lane.b32.xlu0 %v2110_v54, %s2945_s7  ;;  %2841 = vmatprep.subr.bf16.mxu1 %v2840_v46 }
 0x638   :  { %2835 = vmatpush3.bf16.msra.mxu0 %v2832_v59  ;;  %2843 = vmatpush3.bf16.msra.mxu1 %v2840_v46 }
 0x639   :  { %2189 = vrot.lane.b32.xlu1 %v2109_v57, %s2944_s6  ;;  %2845 = vmatprep.subr.bf16.mxu0 %v2844_v8 }
 0x63d   :  { %2199 = vrot.lane.b32.xlu1 %v2178_v14, %s2945_s7 }
 0x6a3   :  { %v2184_v60 = vpop.permute.xlu1 %2183 }
 0x6a4   :  { %v2182_v61 = vpop.permute.xlu0 %2181  ;;  %v2204_v19 = vsel %vm1145_vm1, %v2175_v26, %v2184_v60  ;;  %v2580_v26 = vld [vmem:[%s3428_s1 + $0x3] ss:$0 sm:$0xff] }
 0x6a5   :  { %v2203_v2 = vsel %vm1145_vm1, %v2107_v7, %v2182_v61  ;;  %v49_v60 = vld [vmem:[%s3428_s1 + $0xc0] sm:$0xff]  ;;  %v50_v61 = vld [vmem:[%s3428_s1 + $0xc8] sm:$0xff] }
 0x6a7   :  { %v2192_v62 = vpop.permute.xlu1 %2191 }
 0x6a8   :  { %v2198_v4 = vpop.permute.xlu0 %2197  ;;  %v2206_v21 = vsel %vm1494_vm3, %v2204_v19, %v2192_v62  ;;  %v2856_v62 = vpack.c.bf16 %v50_v61, %v49_v60 }
 0x6ab   :  { %v2190_v3 = vpop.permute.xlu1 %2189 }
 0x6ac   :  { %v2205_v17 = vsel %vm1494_vm3, %v2203_v2, %v2190_v3  ;;  %v2581_v2 = vld [vmem:[%s3428_s1 + $0x7] ss:$0 sm:$0xff] }
 0x6ad   :  { %v2208_v18 = vsel %vm2207_vm4, %v2205_v17, %v2198_v4 }
 0x6ae   :  { %2739 = vmatprep.mubr.msk.f32.mxu0 %vm53_vm0, %v2208_v18 }
 0x6af   :  { %v2200_v15 = vpop.permute.xlu1 %2199 }
 0x6b0   :  { %v2209_v22 = vsel %vm2207_vm4, %v2206_v21, %v2200_v15  ;;  %v2584_v15 = vld [vmem:[%s3428_s1 + $0x8] ss:$0 sm:$0xff] }
 0x6b1   :  { %2740 = vmatmul.mubr.msk.f32.vlgmr.msra.gmra.mrb[8].mxu0 %vm53_vm0, %v2209_v22 }
 0x6b2   :  { %2847 = vmatpush3.bf16.msra.mxu0 %v2844_v8 }
 0x6b3   :  { %2849 = vmatprep.subr.bf16.mxu0 %v2848_v63 }
 0x6b6   :  { %2851 = vmatpush3.bf16.msra.mxu0 %v2848_v63 }
 0x6b7   :  { %2853 = vmatprep.subr.bf16.mxu0 %v2852_v55 }
 0x6ba   :  { %2855 = vmatpush3.bf16.msra.mxu0 %v2852_v55 }
 0x6bb   :  { %2857 = vmatprep.subr.bf16.mxu0 %v2856_v62 }
 0x6be   :  { %2859 = vmatpush3.bf16.msra.mxu0 %v2856_v62 }
 0x784   :  { %v2741_v16 = vpop.f32.mrb[8].mxu0 }
 0x785   :  { %v2292_v24 = vadd.f32 %v2741_v16, %v2576_v23  ;;  %v2286_v20 = vpop.f32.mrb[9].mxu0 }
 0x786   :  { %v2287_v25 = vadd.f32 %v2576_v23, %v2286_v20 }
 0x787   :  { %v3345_v28 = vadd.f32 %v2911_v27, %v2292_v24 }
 0x788   :  { %v3350_v30 = vadd.f32 %v2912_v29, %v2287_v25 }
 0x789   :  { %v2300_v31 = vsel %vm53_vm0, %v3345_v28, 0.0 }
 0x78a   :  { %2301 = vadd.xlane.f32.xlu1 %v2300_v31  ;;  %v2297_v32 = vsel %vm53_vm0, %v3350_v30, 0.0 }
 0x78b   :  { %2298 = vadd.xlane.f32.xlu0 %v2297_v32 }
 0x817   :  { %v2302_v33 = vpop.xlane.xlu1 %2301 }
 0x818   :  { %v2304_v34 = vmul.f32 0.03125, %v2302_v33  ;;  %v2299_v35 = vpop.xlane.xlu0 %2298 }
 0x819   :  { %v2303_v36 = vmul.f32 0.03125, %v2299_v35 }
 0x81a   :  { %v2306_v37 = vsub.f32 %v3345_v28, %v2304_v34 }
 0x81b   :  { %v2305_v39 = vsub.f32 %v3350_v30, %v2303_v36 }
 0x81c   :  { %v2308_v42 = vmul.f32 %v2306_v37, %v2306_v37 }
 0x81d   :  { %v2307_v40 = vmul.f32 %v2305_v39, %v2305_v39 }
 0x81e   :  { %v2312_v43 = vsel %vm53_vm0, %v2308_v42, 0.0 }
 0x81f   :  { %v2309_v41 = vsel %vm53_vm0, %v2307_v40, 0.0 }
 0x820   :  { %2310 = vadd.xlane.f32.xlu0 %v2309_v41 }
 0x824   :  { %2313 = vadd.xlane.f32.xlu0 %v2312_v43 }
 0x8ad   :  { %v2311_v56 = vpop.xlane.xlu0 %2310 }
 0x8ae   :  { %v2315_v0 = vmul.f32 0.03125, %v2311_v56 }
 0x8b0   :  { %v2317_v6 = vadd.f32 1e-05, %v2315_v0 }
 0x8b1   :  { %v2314_v11 = vpop.xlane.xlu0 %2313 }
 0x8b2   :  { %2907 = vrsqrt.f32 %v2317_v6  ;;  %v2316_v12 = vmul.f32 0.03125, %v2314_v11 }
 0x8b4   :  { %v2318_v5 = vadd.f32 1e-05, %v2316_v12 }
 0x8b6   :  { %2909 = vrsqrt.f32 %v2318_v5 }
 0x8bc   :  { %v2908_v13 = vpop.eup %2907 }
 0x8bd   :  { %v2321_v14 = vmul.f32 %v2908_v13, %v2305_v39 }
 0x8bf   :  { %v2327_v53 = vmul.f32 %v2579_v10, %v2321_v14 }
 0x8c0   :  { %v2910_v54 = vpop.eup %2909 }
 0x8c1   :  { %v2322_v57 = vmul.f32 %v2910_v54, %v2306_v37  ;;  %v2333_v7 = vadd.f32 %v2580_v26, %v2327_v53 }
 0x8c3   :  { %v2328_v58 = vmul.f32 %v2579_v10, %v2322_v57  ;;  %2750 = vmatprep.mubr.msk.f32.mxu1 %vm53_vm0, %v2333_v7 }
 0x8c5   :  { %v2334_v59 = vadd.f32 %v2580_v26, %v2328_v58 }
 0x8c7   :  { %2751 = vmatmul.mubr.msk.f32.vlgmr.msra.gmra.mrb[12].mxu1 %vm53_vm0, %v2334_v59 }
 0x99a   :  { %v2752_v3 = vpop.f32.mrb[12].mxu1 }
 0x99b   :  { %v2417_v4 = vadd.f32 %v2752_v3, %v2581_v2  ;;  %v2411_v17 = vpop.f32.mrb[13].mxu1 }
 0x99c   :  { %v2412_v18 = vadd.f32 %v2581_v2, %v2411_v17 }
 0x99d   :  { %v2421_v21 = vmax.f32 %v2417_v4, 0.0 }
 0x99e   :  { %v2420_v19 = vmax.f32 %v2412_v18, 0.0 }
 0x9a0   :  { %2769 = vmatprep.mubr.msk.f32.mxu0 %vm2426_vm5, %v2420_v19 }
 0x9a1   :  { %2770 = vmatmul.mubr.msk.f32.vlgmr.msra.gmra.mrb[10].mxu0 %vm2426_vm5, %v2421_v21 }
 0xa74   :  { %v2771_v22 = vpop.f32.mrb[10].mxu0 }
 0xa75   :  { %v2505_v23 = vadd.f32 %v2771_v22, %v2584_v15  ;;  %v2499_v16 = vpop.f32.mrb[11].mxu0 }
 0xa76   :  { %v2500_v24 = vadd.f32 %v2584_v15, %v2499_v16 }
 0xa77   :  { %v2509_v20 = vadd.f32 %v2505_v23, %v3345_v28 }
 0xa78   :  { %v2508_v25 = vadd.f32 %v2500_v24, %v3350_v30 }
 0xa79   :  { %2511 = vst.msk [vmem:[#allocation2 + $0x8] sm:$0xff] %vm53_vm0, %v2509_v20 }
 0xa7a   :  { %2510 = vst.msk [vmem:[#allocation2] sm:$0xff] %vm53_vm0, %v2508_v25 }
 0xa7b   :  { %2924 = shalt.err (!%p2921_p4)
}
 0xa7c   :  { %s2925_s21 = scalar_lea.hbm %s3429_s2, 256 }
 0xa7d   :  { %p2926_p5 = scmp.ne.s32.totalorder %s3429_s2, %s2925_s21  ;;  %p2929_p6 = scmp.lt.u32.totalorder %s2925_s21, %s3429_s2 }
 0xa7f   :  { %p2931_p7 = pnand %p2929_p6, %p2926_p5 }
 0xa81   :  { %2934 = shalt.err (!%p2931_p7)
}
 0xa82   :  { %s2947_s26 = smov 128  }
 0xa83   :  { %2523 = dma.vmem_to_hbm [thread:$0]  %s2518_s18, 256, %s3429_s2, [#allocation3], %s2947_s26, %s2947_s26, %s2943_s5  }
 0xa84   :  { %2935 = dma.done.wait [#allocation3], 256  }
 0xa85   :  { %2936 = vsyncadd [#allocation3], 4294967040 }
 0xa86   :  { %2527 = vsyncpa [#allocation3], 1 }

</bundles_post_ra>
